<compile_context>
chip_gen: v7x
topology: tpu7x:2x2x1
jax: 0.10.0
libtpu: 0.0.40
codegen_flags: <defaults>
</compile_context>

<pallas_src>
import functools

import jax
import jax.numpy as jnp
from jax import lax
from jax.experimental import pallas as pl
from jax.experimental.pallas import tpu as pltpu


def _cdiv(a, b):
    return (a + b - 1) // b


def _round_up(a, b):
    return _cdiv(a, b) * b


def _box_loss(px, py, pw, ph, tx, ty, tw, th, *, loss_type):
    """Per-box IoU / GIoU loss on dense (TR, 128) f32 coordinate planes."""
    # Hoisted half extents (reused for tl/br and the giou enclosure corners).
    hpw = pw * 0.5
    hph = ph * 0.5
    htw = tw * 0.5
    hth = th * 0.5

    p_x1 = px - hpw
    p_x2 = px + hpw
    p_y1 = py - hph
    p_y2 = py + hph
    t_x1 = tx - htw
    t_x2 = tx + htw
    t_y1 = ty - hth
    t_y2 = ty + hth

    # Intersection corners.
    tl_x = jnp.maximum(p_x1, t_x1)
    tl_y = jnp.maximum(p_y1, t_y1)
    br_x = jnp.minimum(p_x2, t_x2)
    br_y = jnp.minimum(p_y2, t_y2)

    area_p = pw * ph
    area_g = tw * th

    # area_i = relu(w) * relu(h) — mathematically identical to the PyTorch
    # (tl < br).prod() masking, but drops the compare/and/select chain (VPU).
    area_i = jnp.maximum(br_x - tl_x, 0.0) * jnp.maximum(br_y - tl_y, 0.0)
    area_u = area_p + area_g - area_i

    # Divide moved to the (otherwise idle) EUP slot.
    iou = area_i * pl.reciprocal(area_u + 1e-16, approx=True)

    if loss_type == "iou":
        return 1.0 - iou * iou
    if loss_type == "giou":
        c_w = jnp.maximum(p_x2, t_x2) - jnp.minimum(p_x1, t_x1)
        c_h = jnp.maximum(p_y2, t_y2) - jnp.minimum(p_y1, t_y1)
        area_c = c_w * c_h
        giou = iou - (area_c - area_u) * pl.reciprocal(
            jnp.maximum(area_c, 1e-16), approx=True)
        return 1.0 - jnp.clip(giou, -1.0, 1.0)
    raise ValueError(f"unknown loss_type: {loss_type}")


def _iou_loss_kernel(boxes_ref, out_ref, *, loss_type):
    # boxes_ref: (8, tr, 128) f32 planes
    #   [pred_cx, pred_cy, pred_w, pred_h, tgt_cx, tgt_cy, tgt_w, tgt_h]
    # out_ref:  (tr, 128) f32 — lane- and sublane-dense per-box loss.
    c = [boxes_ref[k] for k in range(8)]
    out_ref[...] = _box_loss(*c, loss_type=loss_type)


def _iou_loss_partial_kernel(boxes_ref, out_ref, *, loss_type, n, tile_rows):
    # Per-tile partial sum on a 'parallel' grid axis (megacore friendly).
    # out_ref is an (8, 128) block; the tile's partial sum lands at [0, 0] and
    # the rest is exact zeros, so the wrapper can jnp.sum() the whole output.
    i = pl.program_id(0)
    c = [boxes_ref[k] for k in range(8)]
    loss = _box_loss(*c, loss_type=loss_type)

    def store_partial(partial):
        r = lax.broadcasted_iota(jnp.int32, (8, 128), 0)
        l = lax.broadcasted_iota(jnp.int32, (8, 128), 1)
        out_ref[...] = jnp.where((r == 0) & (l == 0), partial, 0.0)

    last = pl.num_programs(0) - 1

    @pl.when(i != last)
    def _():
        store_partial(jnp.sum(loss))

    @pl.when(i == last)
    def _():
        # Padded tail boxes live only in the last tile; mask them only here so
        # steady-state steps skip the iota/compare/select work entirely.
        # (int32 global index: fine below ~2.1e9 padded boxes.)
        row = lax.broadcasted_iota(jnp.int32, loss.shape, 0)
        lane = lax.broadcasted_iota(jnp.int32, loss.shape, 1)
        gidx = (i * tile_rows + row) * 128 + lane
        store_partial(jnp.sum(jnp.where(gidx < n, loss, 0.0)))


def _iou_loss_call(boxes, n, tr, reduction, loss_type):
    """boxes: (8, R, 128) f32 planes; R % tr == 0, tr % 8 == 0; n real boxes."""
    _, R, _ = boxes.shape
    grid = (R // tr,)

    in_specs = [pl.BlockSpec((8, tr, 128), lambda i: (0, i, 0))]

    # Double-buffered input + output blocks, with headroom; clamp to a limit
    # that is safe on every generation (v5e 16 MiB scoped default, v7x 64 MiB
    # physical VMEM).
    in_block_bytes = 8 * tr * 128 * 4
    out_block_bytes = tr * 128 * 4
    vmem_limit = int(min(48 << 20,
                         max(16 << 20, 3 * (in_block_bytes + out_block_bytes))))
    cparams = pltpu.CompilerParams(
        dimension_semantics=("parallel",), vmem_limit_bytes=vmem_limit)

    if reduction in ("mean", "sum"):
        partials = pl.pallas_call(
            functools.partial(_iou_loss_partial_kernel, loss_type=loss_type,
                              n=n, tile_rows=tr),
            out_shape=jax.ShapeDtypeStruct((8, grid[0] * 128), jnp.float32),
            grid_spec=pltpu.PrefetchScalarGridSpec(
                num_scalar_prefetch=0, grid=grid,
                in_specs=in_specs,
                out_specs=pl.BlockSpec((8, 128), lambda i: (0, i))),
            compiler_params=cparams,
        )(boxes)
        total = jnp.sum(partials)   # only the [0, i*128] entries are non-zero
        if reduction == "mean":
            return total / jnp.float32(n)
        return total

    # reduction == 'none' (or anything else, mirroring the PyTorch module):
    # per-box losses, lane+sublane dense output, sliced in the wrapper.
    out = pl.pallas_call(
        functools.partial(_iou_loss_kernel, loss_type=loss_type),
        out_shape=jax.ShapeDtypeStruct((R, 128), jnp.float32),
        grid_spec=pltpu.PrefetchScalarGridSpec(
            num_scalar_prefetch=0, grid=grid,
            in_specs=in_specs,
            out_specs=pl.BlockSpec((tr, 128), lambda i: (i, 0))),
        compiler_params=cparams,
    )(boxes)
    return out.reshape(-1)[:n]


def iou_loss(pred, target, reduction="none", loss_type="iou", tile_rows=512):
    """Pallas implementation of IOUloss.forward.

    pred/target: (..., 4) boxes in (cx, cy, w, h); flattened to (-1, 4).
    reduction: 'none' | 'mean' | 'sum' (anything else behaves like 'none',
    matching the PyTorch module). loss_type: 'iou' | 'giou'.
    """
    assert pred.shape[0] == target.shape[0]
    pred = pred.reshape(-1, 4).astype(jnp.float32)
    target = target.reshape(-1, 4).astype(jnp.float32)
    n = pred.shape[0]

    tile_rows = max(8, (int(tile_rows) // 8) * 8)
    n_rows = max(1, _cdiv(n, 128))
    tr = min(tile_rows, _round_up(n_rows, 8))
    # Keep >= 2 grid steps when there is enough work so the 'parallel' axis
    # can shard across both v7x TensorCores (harmless on single-TC v5e/v6e).
    if n_rows >= 16 and _cdiv(n_rows, tr) < 2:
        tr = _round_up(_cdiv(n_rows, 2), 8)
    R = _round_up(n_rows, tr)

    # One fused transpose+pad+reshape -> (8, R, 128) coordinate planes.
    # TODO(synk): this is still one extra HBM pass; produce the planar layout
    # upstream and call iou_loss_packed() to eliminate it, and/or carry the
    # planes as bf16 on v6e/v7x if upstream precision tolerates it.
    boxes = jnp.concatenate([pred.T, target.T], axis=0)          # (8, n)
    boxes = jnp.pad(boxes, ((0, 0), (0, R * 128 - n)))
    boxes = boxes.reshape(8, R, 128)

    return _iou_loss_call(boxes, n, tr, reduction, loss_type)


def iou_loss_packed(boxes, n, reduction="none", loss_type="iou", tile_rows=512):
    """Zero-copy fast path: boxes already packed as (8, R, 128) f32 planes
    [pred_cx, pred_cy, pred_w, pred_h, tgt_cx, tgt_cy, tgt_w, tgt_h], boxes
    lane-major (box k -> row k//128, lane k%128), R % 8 == 0, entries beyond
    the first `n` boxes arbitrary. Skips the wrapper transpose/pad pass."""
    assert boxes.ndim == 3 and boxes.shape[0] == 8 and boxes.shape[2] == 128
    R = boxes.shape[1]
    assert R % 8 == 0 and R * 128 >= n
    boxes = boxes.astype(jnp.float32)

    tile_rows = max(8, (int(tile_rows) // 8) * 8)
    cap = min(tile_rows, R)
    tr = next(t for t in range(cap - cap % 8, 7, -8) if R % t == 0)
    if R // tr < 2 and R >= 16:        # v7x megacore: prefer >= 2 grid steps
        half = (R // 2) - (R // 2) % 8
        tr = next((t for t in range(max(half, 8), 7, -8) if R % t == 0), tr)
    return _iou_loss_call(boxes, n, tr, reduction, loss_type)


def _iou_loss_ref(pred, target, reduction="none", loss_type="iou"):
    """Pure-JAX reference mirroring the PyTorch forward (for verification)."""
    pred = pred.reshape(-1, 4).astype(jnp.float32)
    target = target.reshape(-1, 4).astype(jnp.float32)
    tl = jnp.maximum(pred[:, :2] - pred[:, 2:] / 2, target[:, :2] - target[:, 2:] / 2)
    br = jnp.minimum(pred[:, :2] + pred[:, 2:] / 2, target[:, :2] + target[:, 2:] / 2)
    area_p = jnp.prod(pred[:, 2:], axis=1)
    area_g = jnp.prod(target[:, 2:], axis=1)
    en = jnp.prod((tl < br).astype(jnp.float32), axis=1)
    area_i = jnp.prod(br - tl, axis=1) * en
    area_u = area_p + area_g - area_i
    iou = area_i / (area_u + 1e-16)
    if loss_type == "iou":
        loss = 1 - iou ** 2
    else:  # giou
        c_tl = jnp.minimum(pred[:, :2] - pred[:, 2:] / 2, target[:, :2] - target[:, 2:] / 2)
        c_br = jnp.maximum(pred[:, :2] + pred[:, 2:] / 2, target[:, :2] + target[:, 2:] / 2)
        area_c = jnp.prod(c_br - c_tl, axis=1)
        giou = iou - (area_c - area_u) / jnp.maximum(area_c, 1e-16)
        loss = 1 - jnp.clip(giou, -1.0, 1.0)
    if reduction == "mean":
        loss = loss.mean()
    elif reduction == "sum":
        loss = loss.sum()
    return loss


if __name__ == "__main__":
    def make_boxes(k_xy, k_wh, n):
        # boxes in (cx, cy, w, h) with positive sizes
        return jnp.concatenate(
            [jax.random.uniform(k_xy, (n, 2)) * 10.0,
             jax.random.uniform(k_wh, (n, 2)) * 4.0 + 0.5], axis=1)

    # Tolerances reflect the EUP approximate reciprocal (pl.reciprocal
    # approx=True); any layout/indexing bug would show up as O(1) errors.
    tol = dict(atol=1e-2, rtol=1e-2)

    # --- small case, consistent with the module's pred.view(-1, 4) ---
    k1, k2, k3, k4 = jax.random.split(jax.random.PRNGKey(0), 4)
    n_small = 16
    pred_s = make_boxes(k1, k2, n_small)
    tgt_s = make_boxes(k3, k4, n_small)

    out = jax.block_until_ready(iou_loss(pred_s, tgt_s, "none", "iou"))
    assert out.shape == (n_small,)
    assert jnp.allclose(out, _iou_loss_ref(pred_s, tgt_s, "none", "iou"), **tol)

    out_g = jax.block_until_ready(iou_loss(pred_s, tgt_s, "mean", "giou"))
    assert jnp.allclose(out_g, _iou_loss_ref(pred_s, tgt_s, "mean", "giou"), **tol)

    out_sm = jax.block_until_ready(iou_loss(pred_s, tgt_s, "sum", "iou"))
    assert jnp.allclose(out_sm, _iou_loss_ref(pred_s, tgt_s, "sum", "iou"), **tol)

    # --- multi-tile case: >=2-step parallel grid, last-tile padding mask ---
    n_big = 2053
    kk = jax.random.split(jax.random.PRNGKey(1), 4)
    pred_b = make_boxes(kk[0], kk[1], n_big)
    tgt_b = make_boxes(kk[2], kk[3], n_big)

    out_bn = jax.block_until_ready(iou_loss(pred_b, tgt_b, "none", "giou"))
    assert out_bn.shape == (n_big,)
    assert jnp.allclose(out_bn, _iou_loss_ref(pred_b, tgt_b, "none", "giou"), **tol)

    out_bs = jax.block_until_ready(iou_loss(pred_b, tgt_b, "sum", "iou"))
    assert jnp.allclose(out_bs, _iou_loss_ref(pred_b, tgt_b, "sum", "iou"),
                        rtol=1e-2, atol=1e-1)

    # --- packed fast path (planar layout supplied directly) ---
    R = _round_up(max(1, _cdiv(n_big, 128)), 8)
    packed = jnp.pad(jnp.concatenate([pred_b.T, tgt_b.T], axis=0),
                     ((0, 0), (0, R * 128 - n_big))).reshape(8, R, 128)
    out_pk = jax.block_until_ready(iou_loss_packed(packed, n_big, "mean", "iou"))
    assert jnp.allclose(out_pk, _iou_loss_ref(pred_b, tgt_b, "mean", "iou"), **tol)

    print("KERNEL_OK")
</pallas_src>

<mosaic_0001>
module attributes {stable_mosaic.version = 11 : i64} {
  func.func @_iou_loss_kernel(%arg0: i32, %arg1: memref<8x8x128xf32, #tpu.memory_space<vmem>>, %arg2: memref<8x128xf32, #tpu.memory_space<vmem>>) attributes {dimension_semantics = [#tpu.dimension_semantics<parallel>], iteration_bounds = array<i64: 1>, scalar_prefetch = 0 : i64, scratch_operands = 0 : i64, tpu.core_type = #tpu.core_type<tc>, window_params = [{transform_indices = @transform_0, window_bounds = array<i64: 8, 8, 128>}, {transform_indices = @transform_1, window_bounds = array<i64: 8, 128>}]} {
    %c0 = arith.constant 0 : index
    %c0_0 = arith.constant 0 : index
    %c0_1 = arith.constant 0 : index
    %0 = vector.load %arg1[%c0, %c0_0, %c0_1] : memref<8x8x128xf32, #tpu.memory_space<vmem>>, vector<1x8x128xf32>
    %1 = vector.shape_cast %0 : vector<1x8x128xf32> to vector<8x128xf32>
    %c1 = arith.constant 1 : index
    %c0_2 = arith.constant 0 : index
    %c0_3 = arith.constant 0 : index
    %2 = vector.load %arg1[%c1, %c0_2, %c0_3] : memref<8x8x128xf32, #tpu.memory_space<vmem>>, vector<1x8x128xf32>
    %3 = vector.shape_cast %2 : vector<1x8x128xf32> to vector<8x128xf32>
    %c2 = arith.constant 2 : index
    %c0_4 = arith.constant 0 : index
    %c0_5 = arith.constant 0 : index
    %4 = vector.load %arg1[%c2, %c0_4, %c0_5] : memref<8x8x128xf32, #tpu.memory_space<vmem>>, vector<1x8x128xf32>
    %5 = vector.shape_cast %4 : vector<1x8x128xf32> to vector<8x128xf32>
    %c3 = arith.constant 3 : index
    %c0_6 = arith.constant 0 : index
    %c0_7 = arith.constant 0 : index
    %6 = vector.load %arg1[%c3, %c0_6, %c0_7] : memref<8x8x128xf32, #tpu.memory_space<vmem>>, vector<1x8x128xf32>
    %7 = vector.shape_cast %6 : vector<1x8x128xf32> to vector<8x128xf32>
    %c4 = arith.constant 4 : index
    %c0_8 = arith.constant 0 : index
    %c0_9 = arith.constant 0 : index
    %8 = vector.load %arg1[%c4, %c0_8, %c0_9] : memref<8x8x128xf32, #tpu.memory_space<vmem>>, vector<1x8x128xf32>
    %9 = vector.shape_cast %8 : vector<1x8x128xf32> to vector<8x128xf32>
    %c5 = arith.constant 5 : index
    %c0_10 = arith.constant 0 : index
    %c0_11 = arith.constant 0 : index
    %10 = vector.load %arg1[%c5, %c0_10, %c0_11] : memref<8x8x128xf32, #tpu.memory_space<vmem>>, vector<1x8x128xf32>
    %11 = vector.shape_cast %10 : vector<1x8x128xf32> to vector<8x128xf32>
    %c6 = arith.constant 6 : index
    %c0_12 = arith.constant 0 : index
    %c0_13 = arith.constant 0 : index
    %12 = vector.load %arg1[%c6, %c0_12, %c0_13] : memref<8x8x128xf32, #tpu.memory_space<vmem>>, vector<1x8x128xf32>
    %13 = vector.shape_cast %12 : vector<1x8x128xf32> to vector<8x128xf32>
    %c7 = arith.constant 7 : index
    %c0_14 = arith.constant 0 : index
    %c0_15 = arith.constant 0 : index
    %14 = vector.load %arg1[%c7, %c0_14, %c0_15] : memref<8x8x128xf32, #tpu.memory_space<vmem>>, vector<1x8x128xf32>
    %15 = vector.shape_cast %14 : vector<1x8x128xf32> to vector<8x128xf32>
    %cst = arith.constant 5.000000e-01 : f32
    %16 = vector.broadcast %cst : f32 to vector<8x128xf32>
    %17 = arith.mulf %5, %16 : vector<8x128xf32>
    %cst_16 = arith.constant 5.000000e-01 : f32
    %18 = vector.broadcast %cst_16 : f32 to vector<8x128xf32>
    %19 = arith.mulf %7, %18 : vector<8x128xf32>
    %cst_17 = arith.constant 5.000000e-01 : f32
    %20 = vector.broadcast %cst_17 : f32 to vector<8x128xf32>
    %21 = arith.mulf %13, %20 : vector<8x128xf32>
    %cst_18 = arith.constant 5.000000e-01 : f32
    %22 = vector.broadcast %cst_18 : f32 to vector<8x128xf32>
    %23 = arith.mulf %15, %22 : vector<8x128xf32>
    %24 = arith.subf %1, %17 : vector<8x128xf32>
    %25 = arith.addf %1, %17 : vector<8x128xf32>
    %26 = arith.subf %3, %19 : vector<8x128xf32>
    %27 = arith.addf %3, %19 : vector<8x128xf32>
    %28 = arith.subf %9, %21 : vector<8x128xf32>
    %29 = arith.addf %9, %21 : vector<8x128xf32>
    %30 = arith.subf %11, %23 : vector<8x128xf32>
    %31 = arith.addf %11, %23 : vector<8x128xf32>
    %32 = arith.maximumf %24, %28 : vector<8x128xf32>
    %33 = arith.maximumf %26, %30 : vector<8x128xf32>
    %34 = arith.minimumf %25, %29 : vector<8x128xf32>
    %35 = arith.minimumf %27, %31 : vector<8x128xf32>
    %36 = arith.mulf %5, %7 : vector<8x128xf32>
    %37 = arith.mulf %13, %15 : vector<8x128xf32>
    %38 = arith.subf %34, %32 : vector<8x128xf32>
    %cst_19 = arith.constant 0.000000e+00 : f32
    %39 = vector.broadcast %cst_19 : f32 to vector<8x128xf32>
    %40 = arith.maximumf %38, %39 : vector<8x128xf32>
    %41 = arith.subf %35, %33 : vector<8x128xf32>
    %cst_20 = arith.constant 0.000000e+00 : f32
    %42 = vector.broadcast %cst_20 : f32 to vector<8x128xf32>
    %43 = arith.maximumf %41, %42 : vector<8x128xf32>
    %44 = arith.mulf %40, %43 : vector<8x128xf32>
    %45 = arith.addf %36, %37 : vector<8x128xf32>
    %46 = arith.subf %45, %44 : vector<8x128xf32>
    %cst_21 = arith.constant 1.000000e-16 : f32
    %47 = vector.broadcast %cst_21 : f32 to vector<8x128xf32>
    %48 = arith.addf %46, %47 : vector<8x128xf32>
    %49 = tpu.reciprocal %48 {approx = true} : vector<8x128xf32> -> vector<8x128xf32>
    %50 = arith.mulf %44, %49 : vector<8x128xf32>
    %51 = arith.mulf %50, %50 : vector<8x128xf32>
    %cst_22 = arith.constant 1.000000e+00 : f32
    %52 = vector.broadcast %cst_22 : f32 to vector<8x128xf32>
    %53 = arith.subf %52, %51 : vector<8x128xf32>
    %c0_23 = arith.constant 0 : index
    %c0_24 = arith.constant 0 : index
    %54 = vector.load %arg2[%c0_23, %c0_24] : memref<8x128xf32, #tpu.memory_space<vmem>>, vector<8x128xf32>
    tpu.vector_store %arg2[%c0_23, %c0_24], %53 {strides = array<i32>} : memref<8x128xf32, #tpu.memory_space<vmem>>, vector<8x128xf32>,
    return
  }
  func.func @transform_0(%arg0: i32) -> (i32, i32, i32) {
    %c0_i32 = arith.constant 0 : i32
    %c0_i32_0 = arith.constant 0 : i32
    %c0_i32_1 = arith.constant 0 : i32
    return %c0_i32, %arg0, %c0_i32_0 : i32, i32, i32
  }
  func.func @transform_1(%arg0: i32) -> (i32, i32) {
    %c0_i32 = arith.constant 0 : i32
    %c0_i32_0 = arith.constant 0 : i32
    return %arg0, %c0_i32 : i32, i32
  }
}

</mosaic_0001>

<bundles_post_ra>
// kernel: tpu_custom_call.1
= control target key start
LH: loop header
LB: loop body
LE: loop exit
PB: predicated region body
PF: predicated region fallthrough
CT: control target
= control target key end

     0   :  { %6 = vsyncpa [#allocation3], 0  ;;  %s176_s0 = inlined_call_operand.hbm [shape: f32[8,8,128], index: 0, kind: input, shape index: {}]   ;;  %s177_s1 = inlined_call_operand.hbm [shape: f32[8,128], index: 1, kind: output, shape index: {}]  }
   0x1   :  { %7 = vsyncpa [#allocation4], 0  ;;  %s138_s6 = smov [#allocation2]   ;;  %s90_s10 = scalar_lea.hbm %s176_s0, 1024 }
   0x2   :  { %s13_s7 = sshll.u32 %s138_s6, 4  ;;  %p91_p0 = scmp.ne.s32.totalorder %s176_s0, %s90_s10  ;;  %s14_s7 = int_to_ptr.vmem [resolvable:$true] %s13_s7 }
   0x3   :  { %p94_p1 = scmp.lt.u32.totalorder %s90_s10, %s176_s0 }
   0x5   :  { %p96_p2 = pnand %p94_p1, %p91_p0 }
   0x7   :  { %99 = shalt.err (!%p96_p2)
}
   0x8   :  { %s100_s15 = scalar_lea.vmem %s14_s7, 1024  ;;  %p105_p4 = scmp.lt.s32.totalorder %s14_s7, %s14_s7 }
   0x9   :  { %p101_p3 = scmp.ne.s32.totalorder %s14_s7, %s100_s15  ;;  %p106_p5 = scmp.lt.s32.totalorder %s100_s15, %s100_s15 }
   0xb   :  { %p107_p6 = por %p106_p5, %p105_p4 }
   0xd   :  { %p108_p7 = pnand %p107_p6, %p101_p3 }
   0xf   :  { %111 = shalt.err (!%p108_p7)
}
  0x10   :  { %s139_s16 = smov 128   ;;  %s140_s17 = smov 8  }
  0x11   :  { %19 = dma.hbm_to_vmem [thread:$0]  %s176_s0, 1024, %s14_s7, [#allocation3], %s139_s16, %s139_s16, %s140_s17  }
  0x12   :  { %134 = dma.done.wait [#allocation3], 1024  }
  0x13   :  { %135 = vsyncadd [#allocation3], 4294966272  ;;  %v23_v0 = vld [vmem:[#allocation2] sm:$0xff]  ;;  %v27_v1 = vld [vmem:[#allocation2 + $0x10] sm:$0xff]  ;;  %s141_s0 = smov [#allocation5]  }
  0x14   :  { %v25_v2 = vld [vmem:[#allocation2 + $0x8] sm:$0xff]  ;;  %v29_v3 = vld [vmem:[#allocation2 + $0x18] sm:$0xff]  ;;  %v31_v4 = vld [vmem:[#allocation2 + $0x20] sm:$0xff]  ;;  %v38_v5 = vmul.f32 0.5, %v27_v1  ;;  %s75_s20 = sshll.u32 %s141_s0, 4  ;;  %s76_s20 = int_to_ptr.vmem [resolvable:$true] %s75_s20 }
  0x15   :  { %v33_v6 = vld [vmem:[#allocation2 + $0x28] sm:$0xff]  ;;  %v35_v7 = vld [vmem:[#allocation2 + $0x30] sm:$0xff]  ;;  %v37_v8 = vld [vmem:[#allocation2 + $0x38] sm:$0xff]  ;;  %v39_v9 = vmul.f32 0.5, %v29_v3  ;;  %v54_v20 = vmul.f32 %v29_v3, %v27_v1  ;;  %s112_s21 = scalar_lea.vmem %s76_s20, 128  ;;  %p117_p9 = scmp.lt.s32.totalorder %s76_s20, %s76_s20 }
  0x16   :  { %v40_v10 = vmul.f32 0.5, %v35_v7  ;;  %v41_v11 = vmul.f32 0.5, %v37_v8  ;;  %v42_v12 = vsub.f32 %v23_v0, %v38_v5  ;;  %v43_v13 = vadd.f32 %v38_v5, %v23_v0  ;;  %p113_p8 = scmp.ne.s32.totalorder %s76_s20, %s112_s21  ;;  %p118_p10 = scmp.lt.s32.totalorder %s112_s21, %s112_s21 }
  0x17   :  { %v44_v14 = vsub.f32 %v25_v2, %v39_v9  ;;  %v45_v15 = vadd.f32 %v39_v9, %v25_v2  ;;  %v55_v21 = vmul.f32 %v37_v8, %v35_v7 }
  0x18   :  { %v46_v16 = vsub.f32 %v31_v4, %v40_v10  ;;  %v47_v17 = vadd.f32 %v40_v10, %v31_v4  ;;  %v48_v18 = vsub.f32 %v33_v6, %v41_v11  ;;  %v49_v19 = vadd.f32 %v41_v11, %v33_v6  ;;  %p119_p11 = por %p118_p10, %p117_p9 }
  0x19   :  { %v61_v30 = vadd.f32 %v55_v21, %v54_v20 }
  0x1a   :  { %v50_v22 = vmax.f32 %v42_v12, %v46_v16  ;;  %v51_v23 = vmax.f32 %v44_v14, %v48_v18  ;;  %v52_v24 = vmin.f32 %v43_v13, %v47_v17  ;;  %v53_v25 = vmin.f32 %v45_v15, %v49_v19  ;;  %p120_p12 = pnand %p119_p11, %p113_p8 }
  0x1c   :  { %v56_v26 = vsub.f32 %v52_v24, %v50_v22  ;;  %v58_v27 = vsub.f32 %v53_v25, %v51_v23 }
  0x1e   :  { %v57_v28 = vmax.f32 %v56_v26, 0.0  ;;  %v59_v29 = vmax.f32 %v58_v27, 0.0 }
  0x20   :  { %v60_v31 = vmul.f32 %v59_v29, %v57_v28 }
  0x22   :  { %v62_v32 = vsub.f32 %v61_v30, %v60_v31 }
  0x24   :  { %v63_v33 = vadd.f32 1e-16, %v62_v32 }
  0x26   :  { %88 = vrcp.f32 %v63_v33 }
  0x30   :  { %v89_v34 = vpop.eup %88 }
  0x31   :  { %v65_v35 = vmul.f32 %v89_v34, %v60_v31 }
  0x33   :  { %v66_v36 = vmul.f32 %v65_v35, %v65_v35 }
  0x35   :  { %v67_v37 = vsub.f32 1.0, %v66_v36 }
  0x37   :  { %68 = vst [vmem:[#allocation5] sm:$0xff] %v67_v37 }
  0x38   :  { %123 = shalt.err (!%p120_p12)
}
  0x39   :  { %s124_s24 = scalar_lea.hbm %s177_s1, 128 }
  0x3a   :  { %p125_p13 = scmp.ne.s32.totalorder %s177_s1, %s124_s24  ;;  %p128_p0 = scmp.lt.u32.totalorder %s124_s24, %s177_s1 }
  0x3c   :  { %p130_p1 = pnand %p128_p0, %p125_p13 }
  0x3e   :  { %133 = shalt.err (!%p130_p1)
}
  0x3f   :  { %78 = dma.vmem_to_hbm [thread:$0]  %s76_s20, 128, %s177_s1, [#allocation4]  }
  0x40   :  { %136 = dma.done.wait [#allocation4], 128  }
  0x41   :  { %137 = vsyncadd [#allocation4], 4294967168 }
  0x42   :  { %82 = vsyncpa [#allocation3], 1 }
  0x43   :  { %83 = vsyncpa [#allocation4], 1 }

</bundles_post_ra>
